<compile_context>
chip_gen: v7x
topology: tpu7x:2x2x1
jax: 0.10.0
libtpu: 0.0.40
codegen_flags: <defaults>
</compile_context>

<pallas_src>
import functools

import jax
import jax.numpy as jnp
from jax import lax
from jax.experimental import pallas as pl
from jax.experimental.pallas import tpu as pltpu

LANES = 128
SUBLANES = 8


def _round_up(x, m):
    return (x + m - 1) // m * m


def _num_tensorcores():
    """TensorCores per chip: 2 on megacore-style chips, else 1 (best effort)."""
    try:
        info = pltpu.get_tpu_info()
        for name in ("num_cores", "num_tensorcores", "tensorcore_count",
                     "cores_per_chip", "num_cores_per_chip"):
            v = getattr(info, name, None)
            if isinstance(v, int) and v >= 1:
                return v
    except Exception:
        pass
    try:
        v = getattr(jax.devices()[0], "num_cores", None)
        if isinstance(v, int) and v >= 1:
            return v
    except Exception:
        pass
    return 1


def _focal_unscaled(x, t, gamma):
    """(1 - p_t)**gamma * BCE_with_logits, in f32, WITHOUT the alpha factor.

    z = exp(-|x|) is reused for both the stable BCE log1p term and the
    sigmoid, so only 2 heavy EUP transcendentals (exp, log1p) are needed per
    element.  For binary targets p_t == exp(-bce), matching the reference
    module exactly; the complementary-sigmoid form also avoids the
    1 - exp(-bce) cancellation for easy examples.
    """
    z = jnp.exp(-jnp.abs(x))                             # EUP #1
    bce = jnp.maximum(x, 0.0) - x * t + jnp.log1p(z)     # EUP #2
    s = 1.0 / (1.0 + z)
    zs = z * s
    pos = x >= 0.0
    p = jnp.where(pos, s, zs)                            # sigmoid(x)
    q = jnp.where(pos, zs, s)                            # sigmoid(-x) == 1 - p
    one_minus_pt = t * q + (1.0 - t) * p                 # == 1 - exp(-bce) for t in {0,1}
    # TODO(synk): for soft (non-binary) targets torch's pt=exp(-bce) differs
    # slightly from this p_t formulation.
    g = float(gamma)
    if g == int(g) and 0 <= int(g) <= 4:
        gi = int(g)
        if gi == 0:
            w = jnp.ones_like(one_minus_pt)
        else:
            w = one_minus_pt
            for _ in range(gi - 1):
                w = w * one_minus_pt
    else:
        w = one_minus_pt ** g                            # general-gamma pow path
    return w * bce


def _focal_sum_kernel(x_ref, t_ref, o_ref, acc_ref, *, gamma, rows, tm, full_cover):
    pi = pl.program_id(0)
    ki = pl.program_id(1)

    @pl.when(ki == 0)
    def _():
        acc_ref[...] = jnp.zeros_like(acc_ref)

    x = x_ref[...].astype(jnp.float32)
    t = t_ref[...].astype(jnp.float32)
    f = _focal_unscaled(x, t, gamma)

    def _fold(v):
        # Sublane-only fold of a (tm,128) tile into one (8,128) vreg (pure VPU).
        return jnp.sum(v.reshape(tm // SUBLANES, SUBLANES, LANES), axis=0)

    if full_cover:  # static: every grid slot covers only valid rows
        acc_ref[...] += _fold(f)
    else:
        row0 = (pi * pl.num_programs(1) + ki) * tm       # logical first slab row
        is_full = row0 + tm <= rows

        @pl.when(is_full)
        def _():
            acc_ref[...] += _fold(f)

        @pl.when(jnp.logical_not(is_full))
        def _():
            rid = row0 + lax.broadcasted_iota(jnp.int32, (tm, LANES), 0)
            acc_ref[...] += _fold(jnp.where(rid < rows, f, 0.0))

    @pl.when(ki == pl.num_programs(1) - 1)
    def _():
        # Lane-dense (8,128) partial; tiny final reduce happens in the wrapper.
        o_ref[...] = acc_ref[...]


def _focal_map_kernel(x_ref, t_ref, o_ref, *, alpha, gamma):
    x = x_ref[...].astype(jnp.float32)
    t = t_ref[...].astype(jnp.float32)
    o_ref[...] = (alpha * _focal_unscaled(x, t, gamma)).astype(o_ref.dtype)


def focal_loss(inputs, targets, alpha=0.25, gamma=2, reduction="mean",
               block_rows=2048, num_slices=None):
    """Pallas implementation of FocalLoss.forward ('mean' | 'sum' | 'none')."""
    assert inputs.shape == targets.shape
    if reduction not in ("mean", "sum", "none"):
        raise ValueError(f"unknown reduction {reduction!r}")

    orig_shape = inputs.shape
    n = inputs.size
    x = inputs.reshape(-1)
    t = targets.reshape(-1)

    rem = n % LANES
    if rem:
        # TODO(synk): only remaining HBM copy; a 1-D tail path would remove it,
        # but n % 128 != 0 is rare for NN tensors.  Pad only to the next
        # multiple of 128 with a loss-neutral sentinel (x=+200, t=1:
        # exp(-200) underflows to 0 -> bce == 0 -> focal term == 0 exactly).
        pad = LANES - rem
        x = jnp.concatenate([x, jnp.full((pad,), 200.0, dtype=x.dtype)])
        t = jnp.concatenate([t, jnp.ones((pad,), dtype=t.dtype)])

    rows = (n + LANES - 1) // LANES
    x2 = x.reshape(rows, LANES)
    t2 = t.reshape(rows, LANES)

    # Row alignment accounts for sub-32-bit sublane packing (bf16->16, int8->32).
    row_align = SUBLANES * max(1, 4 // x2.dtype.itemsize, 4 // t2.dtype.itemsize)
    tm = _round_up(max(1, min(block_rows, rows)), row_align)
    tiles = pl.cdiv(rows, tm)

    in_bytes = x2.dtype.itemsize + t2.dtype.itemsize
    out_bytes = inputs.dtype.itemsize if reduction == "none" else 0
    vmem_limit = int(min(48 << 20,
                         max(32 << 20, 3 * tm * LANES * (in_bytes + out_bytes))))

    if reduction == "none":
        out = pl.pallas_call(
            functools.partial(_focal_map_kernel, alpha=float(alpha), gamma=gamma),
            out_shape=jax.ShapeDtypeStruct((rows, LANES), inputs.dtype),
            grid_spec=pltpu.PrefetchScalarGridSpec(
                num_scalar_prefetch=0,
                grid=(tiles,),
                in_specs=[pl.BlockSpec((tm, LANES), lambda i: (i, 0)),
                          pl.BlockSpec((tm, LANES), lambda i: (i, 0))],
                out_specs=pl.BlockSpec((tm, LANES), lambda i: (i, 0)),
            ),
            compiler_params=pltpu.CompilerParams(
                dimension_semantics=("parallel",),
                vmem_limit_bytes=vmem_limit),
        )(x2, t2)
        flat = out.reshape(-1)
        if rem:
            flat = flat[:n]
        return flat.reshape(orig_shape)

    # --- sum / mean: accumulate per outer slice, scale the scalar afterwards.
    n_par = num_slices if num_slices is not None else _num_tensorcores()
    n_par = max(1, min(int(n_par), tiles))
    k_steps = pl.cdiv(tiles, n_par)
    full_cover = (n_par * k_steps * tm == rows)
    last_tile = tiles - 1

    def tile_index(pi, ki):
        # Clamp so over-covering slots never start a DMA past the slab end;
        # the kernel masks their contribution to exactly zero.
        return (jnp.minimum(pi * k_steps + ki, last_tile), 0)

    partials = pl.pallas_call(
        functools.partial(_focal_sum_kernel, gamma=gamma, rows=rows, tm=tm,
                          full_cover=full_cover),
        out_shape=jax.ShapeDtypeStruct((n_par * SUBLANES, LANES), jnp.float32),
        grid_spec=pltpu.PrefetchScalarGridSpec(
            num_scalar_prefetch=0,
            grid=(n_par, k_steps),
            in_specs=[pl.BlockSpec((tm, LANES), tile_index),
                      pl.BlockSpec((tm, LANES), tile_index)],
            out_specs=pl.BlockSpec((SUBLANES, LANES), lambda pi, ki: (pi, 0)),
            scratch_shapes=[pltpu.VMEM((SUBLANES, LANES), jnp.float32)],
        ),
        compiler_params=pltpu.CompilerParams(
            dimension_semantics=("parallel", "arbitrary"),
            vmem_limit_bytes=vmem_limit),
    )(x2, t2)

    total = jnp.sum(partials, dtype=jnp.float32)
    scale = float(alpha) / n if reduction == "mean" else float(alpha)
    return (total * scale).astype(inputs.dtype)


def focal_loss_ref(inputs, targets, alpha=0.25, gamma=2, reduction="mean"):
    """Pure-JAX reference with the exact torch formulation (pt = exp(-bce))."""
    x = inputs.astype(jnp.float32)
    t = targets.astype(jnp.float32)
    bce = jnp.maximum(x, 0.0) - x * t + jnp.log1p(jnp.exp(-jnp.abs(x)))
    pt = jnp.exp(-bce)
    f = alpha * (1.0 - pt) ** gamma * bce
    if reduction == "mean":
        return jnp.mean(f)
    if reduction == "sum":
        return jnp.sum(f)
    return f


if __name__ == "__main__":
    key = jax.random.PRNGKey(0)
    k1, k2, k3, k4 = jax.random.split(key, 4)

    # Small NCHW-ish logits + binary targets, consistent with the module.
    shape = (2, 4, 16, 16)
    x = jax.random.normal(k1, shape, dtype=jnp.float32) * 2.0
    t = jax.random.bernoulli(k2, p=0.3, shape=shape).astype(jnp.float32)

    out = jax.block_until_ready(focal_loss(x, t, alpha=0.25, gamma=2))
    ref = focal_loss_ref(x, t, alpha=0.25, gamma=2)
    assert jnp.allclose(out, ref, rtol=1e-5, atol=1e-6), (out, ref)

    out_sum = jax.block_until_ready(focal_loss(x, t, reduction="sum"))
    ref_sum = focal_loss_ref(x, t, reduction="sum")
    assert jnp.allclose(out_sum, ref_sum, rtol=1e-5, atol=1e-4), (out_sum, ref_sum)

    out_none = jax.block_until_ready(focal_loss(x, t, reduction="none"))
    ref_none = focal_loss_ref(x, t, reduction="none")
    assert jnp.allclose(out_none, ref_none, rtol=1e-5, atol=1e-6)

    # Ragged size (n % 128 != 0), tiny blocks and a forced 2-way outer split:
    # exercises the 128-pad fallback, in-kernel row masking of the partial
    # last tile, multi-step reduction and the clamped over-covering slot.
    shape2 = (3, 5, 11, 13)
    x2 = jax.random.normal(k3, shape2, dtype=jnp.float32) * 3.0
    t2 = jax.random.bernoulli(k4, p=0.5, shape=shape2).astype(jnp.float32)
    out2 = jax.block_until_ready(focal_loss(x2, t2, block_rows=8, num_slices=2))
    ref2 = focal_loss_ref(x2, t2)
    assert jnp.allclose(out2, ref2, rtol=1e-5, atol=1e-6), (out2, ref2)

    out2n = jax.block_until_ready(focal_loss(x2, t2, reduction="none", block_rows=8))
    ref2n = focal_loss_ref(x2, t2, reduction="none")
    assert jnp.allclose(out2n, ref2n, rtol=1e-5, atol=1e-6)

    # bf16 logits/targets fed directly (kernel casts to f32 internally).
    xb = x.astype(jnp.bfloat16)
    tb = t.astype(jnp.bfloat16)
    outb = jax.block_until_ready(focal_loss(xb, tb))
    refb = focal_loss_ref(xb, tb)
    assert jnp.allclose(outb.astype(jnp.float32), refb, rtol=1e-2, atol=1e-3)

    print("KERNEL_OK")
</pallas_src>

<mosaic_0001>
module attributes {stable_mosaic.version = 11 : i64} {
  func.func @_focal_sum_kernel(%arg0: i32, %arg1: i32, %arg2: memref<16x128xf32, #tpu.memory_space<vmem>>, %arg3: memref<16x128xf32, #tpu.memory_space<vmem>>, %arg4: memref<8x128xf32, #tpu.memory_space<vmem>>, %arg5: memref<8x128xf32, #tpu.memory_space<vmem>>) attributes {dimension_semantics = [#tpu.dimension_semantics<parallel>, #tpu.dimension_semantics<arbitrary>], iteration_bounds = array<i64: 1, 1>, scalar_prefetch = 0 : i64, scratch_operands = 1 : i64, tpu.core_type = #tpu.core_type<tc>, window_params = [{transform_indices = @transform_0, window_bounds = array<i64: 16, 128>}, {transform_indices = @transform_1, window_bounds = array<i64: 16, 128>}, {transform_indices = @transform_2, window_bounds = array<i64: 8, 128>}]} {
    %c0_i32 = arith.constant 0 : i32
    %0 = arith.cmpi eq, %arg1, %c0_i32 : i32
    %1 = arith.extui %0 : i1 to i32
    %c0_i32_0 = arith.constant 0 : i32
    %2 = arith.cmpi ne, %1, %c0_i32_0 : i32
    scf.if %2 {
      %cst_16 = arith.constant 0.000000e+00 : f32
      %39 = vector.broadcast %cst_16 : f32 to vector<8x128xf32>
      %c0_17 = arith.constant 0 : index
      %c0_18 = arith.constant 0 : index
      %40 = vector.load %arg5[%c0_17, %c0_18] : memref<8x128xf32, #tpu.memory_space<vmem>>, vector<8x128xf32>
      tpu.vector_store %arg5[%c0_17, %c0_18], %39 {strides = array<i32>} : memref<8x128xf32, #tpu.memory_space<vmem>>, vector<8x128xf32>,
    } else {
    }
    %c0 = arith.constant 0 : index
    %c0_1 = arith.constant 0 : index
    %3 = vector.load %arg2[%c0, %c0_1] : memref<16x128xf32, #tpu.memory_space<vmem>>, vector<16x128xf32>
    %c0_2 = arith.constant 0 : index
    %c0_3 = arith.constant 0 : index
    %4 = vector.load %arg3[%c0_2, %c0_3] : memref<16x128xf32, #tpu.memory_space<vmem>>, vector<16x128xf32>
    %5 = math.absf %3 : vector<16x128xf32>
    %cst = arith.constant 0.000000e+00 : f32
    %6 = vector.broadcast %cst : f32 to vector<16x128xf32>
    %7 = arith.subf %6, %5 : vector<16x128xf32>
    %8 = math.exp %7 : vector<16x128xf32>
    %cst_4 = arith.constant 0.000000e+00 : f32
    %9 = vector.broadcast %cst_4 : f32 to vector<16x128xf32>
    %10 = arith.maximumf %3, %9 : vector<16x128xf32>
    %11 = arith.mulf %3, %4 : vector<16x128xf32>
    %12 = arith.subf %10, %11 : vector<16x128xf32>
    %13 = math.log1p %8 : vector<16x128xf32>
    %14 = arith.addf %12, %13 : vector<16x128xf32>
    %cst_5 = arith.constant 1.000000e+00 : f32
    %15 = vector.broadcast %cst_5 : f32 to vector<16x128xf32>
    %16 = arith.addf %15, %8 : vector<16x128xf32>
    %cst_6 = arith.constant 1.000000e+00 : f32
    %17 = vector.broadcast %cst_6 : f32 to vector<16x128xf32>
    %18 = arith.divf %17, %16 : vector<16x128xf32>
    %19 = arith.mulf %8, %18 : vector<16x128xf32>
    %cst_7 = arith.constant 0.000000e+00 : f32
    %20 = vector.broadcast %cst_7 : f32 to vector<16x128xf32>
    %21 = arith.cmpf oge, %3, %20 : vector<16x128xf32>
    %22 = arith.select %21, %18, %19 : vector<16x128xi1>, vector<16x128xf32>
    %23 = arith.select %21, %19, %18 : vector<16x128xi1>, vector<16x128xf32>
    %24 = arith.mulf %4, %23 : vector<16x128xf32>
    %cst_8 = arith.constant 1.000000e+00 : f32
    %25 = vector.broadcast %cst_8 : f32 to vector<16x128xf32>
    %26 = arith.subf %25, %4 : vector<16x128xf32>
    %27 = arith.mulf %26, %22 : vector<16x128xf32>
    %28 = arith.addf %24, %27 : vector<16x128xf32>
    %29 = arith.mulf %28, %28 : vector<16x128xf32>
    %30 = arith.mulf %29, %14 : vector<16x128xf32>
    %c0_9 = arith.constant 0 : index
    %c0_10 = arith.constant 0 : index
    %31 = vector.load %arg5[%c0_9, %c0_10] : memref<8x128xf32, #tpu.memory_space<vmem>>, vector<8x128xf32>
    %32 = vector.shape_cast %30 : vector<16x128xf32> to vector<2x8x128xf32>
    %cst_11 = arith.constant dense<0.000000e+00> : vector<8x128xf32>
    %33 = vector.multi_reduction <add>, %32, %cst_11 [0] : vector<2x8x128xf32> to vector<8x128xf32>
    %34 = arith.addf %31, %33 : vector<8x128xf32>
    %c0_12 = arith.constant 0 : index
    %c0_13 = arith.constant 0 : index
    %35 = vector.load %arg5[%c0_12, %c0_13] : memref<8x128xf32, #tpu.memory_space<vmem>>, vector<8x128xf32>
    tpu.vector_store %arg5[%c0_12, %c0_13], %34 {strides = array<i32>} : memref<8x128xf32, #tpu.memory_space<vmem>>, vector<8x128xf32>,
    %c0_i32_14 = arith.constant 0 : i32
    %36 = arith.cmpi eq, %arg1, %c0_i32_14 : i32
    %37 = arith.extui %36 : i1 to i32
    %c0_i32_15 = arith.constant 0 : i32
    %38 = arith.cmpi ne, %37, %c0_i32_15 : i32
    scf.if %38 {
      %c0_16 = arith.constant 0 : index
      %c0_17 = arith.constant 0 : index
      %39 = vector.load %arg5[%c0_16, %c0_17] : memref<8x128xf32, #tpu.memory_space<vmem>>, vector<8x128xf32>
      %c0_18 = arith.constant 0 : index
      %c0_19 = arith.constant 0 : index
      %40 = vector.load %arg4[%c0_18, %c0_19] : memref<8x128xf32, #tpu.memory_space<vmem>>, vector<8x128xf32>
      tpu.vector_store %arg4[%c0_18, %c0_19], %39 {strides = array<i32>} : memref<8x128xf32, #tpu.memory_space<vmem>>, vector<8x128xf32>,
    } else {
    }
    return
  }
  func.func @transform_0(%arg0: i32, %arg1: i32) -> (i32, i32) {
    %c1_i32 = arith.constant 1 : i32
    %0 = arith.muli %arg0, %c1_i32 : i32
    %1 = arith.addi %0, %arg1 : i32
    %c0_i32 = arith.constant 0 : i32
    %2 = arith.minsi %1, %c0_i32 : i32
    %c0_i32_0 = arith.constant 0 : i32
    %c0_i32_1 = arith.constant 0 : i32
    return %2, %c0_i32_0 : i32, i32
  }
  func.func @transform_1(%arg0: i32, %arg1: i32) -> (i32, i32) {
    %c1_i32 = arith.constant 1 : i32
    %0 = arith.muli %arg0, %c1_i32 : i32
    %1 = arith.addi %0, %arg1 : i32
    %c0_i32 = arith.constant 0 : i32
    %2 = arith.minsi %1, %c0_i32 : i32
    %c0_i32_0 = arith.constant 0 : i32
    %c0_i32_1 = arith.constant 0 : i32
    return %2, %c0_i32_0 : i32, i32
  }
  func.func @transform_2(%arg0: i32, %arg1: i32) -> (i32, i32) {
    %c0_i32 = arith.constant 0 : i32
    %c0_i32_0 = arith.constant 0 : i32
    return %arg0, %c0_i32 : i32, i32
  }
}

</mosaic_0001>

<bundles_post_ra>
// kernel: tpu_custom_call.1
= control target key start
LH: loop header
LB: loop body
LE: loop exit
PB: predicated region body
PF: predicated region fallthrough
CT: control target
= control target key end

     0   :  { %7 = vsyncpa [#allocation4], 0  ;;  %s317_s0 = inlined_call_operand.hbm [shape: f32[16,128], index: 0, kind: input, shape index: {}]   ;;  %s318_s1 = inlined_call_operand.hbm [shape: f32[16,128], index: 1, kind: input, shape index: {}]   ;;  %s319_s2 = inlined_call_operand.hbm [shape: f32[8,128], index: 2, kind: output, shape index: {}]  }
   0x1   :  { %8 = vsyncpa [#allocation7], 0 }
   0x2   :  { %9 = vsyncpa [#allocation5], 0  ;;  %s247_s9 = smov [#allocation3]   ;;  %s175_s13 = scalar_lea.hbm %s317_s0, 256 }
   0x3   :  { %s21_s10 = sshll.u32 %s247_s9, 4  ;;  %p176_p0 = scmp.ne.s32.totalorder %s317_s0, %s175_s13  ;;  %s22_s10 = int_to_ptr.vmem [resolvable:$true] %s21_s10 }
   0x4   :  { %p179_p1 = scmp.lt.u32.totalorder %s175_s13, %s317_s0 }
   0x6   :  { %p181_p2 = pnand %p179_p1, %p176_p0 }
   0x8   :  { %184 = shalt.err (!%p181_p2)
}
   0x9   :  { %s185_s18 = scalar_lea.vmem %s22_s10, 256  ;;  %p190_p4 = scmp.lt.s32.totalorder %s22_s10, %s22_s10 }
   0xa   :  { %p186_p3 = scmp.ne.s32.totalorder %s22_s10, %s185_s18  ;;  %p191_p5 = scmp.lt.s32.totalorder %s185_s18, %s185_s18 }
   0xc   :  { %p192_p6 = por %p191_p5, %p190_p4 }
   0xe   :  { %p193_p7 = pnand %p192_p6, %p186_p3 }
  0x10   :  { %196 = shalt.err (!%p193_p7)
}
  0x11   :  { %s248_s19 = smov 128   ;;  %s249_s20 = smov 8  }
  0x12   :  { %27 = dma.hbm_to_vmem [thread:$0]  %s317_s0, 256, %s22_s10, [#allocation4], %s248_s19, %s248_s19, %s249_s20  }
  0x13   :  { %s250_s23 = smov [#allocation6]   ;;  %s197_s27 = scalar_lea.hbm %s318_s1, 256 }
  0x14   :  { %s39_s24 = sshll.u32 %s250_s23, 4  ;;  %p198_p8 = scmp.ne.s32.totalorder %s318_s1, %s197_s27  ;;  %s40_s24 = int_to_ptr.vmem [resolvable:$true] %s39_s24 }
  0x15   :  { %p201_p9 = scmp.lt.u32.totalorder %s197_s27, %s318_s1 }
  0x17   :  { %p203_p10 = pnand %p201_p9, %p198_p8 }
  0x19   :  { %206 = shalt.err (!%p203_p10)
}
  0x1a   :  { %s207_s4 = scalar_lea.vmem %s40_s24, 256  ;;  %p212_p12 = scmp.lt.s32.totalorder %s40_s24, %s40_s24 }
  0x1b   :  { %p208_p11 = scmp.ne.s32.totalorder %s40_s24, %s207_s4  ;;  %p213_p13 = scmp.lt.s32.totalorder %s207_s4, %s207_s4 }
  0x1d   :  { %p214_p0 = por %p213_p13, %p212_p12 }
  0x1f   :  { %p215_p1 = pnand %p214_p0, %p208_p11 }
  0x21   :  { %218 = shalt.err (!%p215_p1)
}
  0x22   :  { %45 = dma.hbm_to_vmem [thread:$0]  %s318_s1, 256, %s40_s24, [#allocation7], %s248_s19, %s248_s19, %s249_s20  }
  0x23   :  { %241 = dma.done.wait [#allocation4], 256  }
  0x24   :  { %242 = vsyncadd [#allocation4], 4294967040 }
  0x25   :  { %243 = dma.done.wait [#allocation7], 256  }
  0x26   :  { %244 = vsyncadd [#allocation7], 4294967040  ;;  %v65_v0 = vld [vmem:[#allocation3] sm:$0xff]  ;;  %v66_v1 = vld [vmem:[#allocation3 + $0x8] sm:$0xff]  ;;  %s251_s1 = smov [#allocation8]  }
  0x27   :  { %v69_v2 = vand.u32 2147483647, %v65_v0  ;;  %v70_v3 = vand.u32 2147483647, %v66_v1  ;;  %v67_v16 = vld [vmem:[#allocation6] sm:$0xff]  ;;  %v68_v19 = vld [vmem:[#allocation6 + $0x8] sm:$0xff] }
  0x28   :  { %v77_v20 = vmax.f32 %v65_v0, 0.0  ;;  %v78_v22 = vmax.f32 %v66_v1, 0.0  ;;  %v79_v23 = vmul.f32 %v67_v16, %v65_v0  ;;  %v80_v24 = vmul.f32 %v68_v19, %v66_v1  ;;  %s144_s6 = sshll.u32 %s251_s1, 4  ;;  %s145_s6 = int_to_ptr.vmem [resolvable:$true] %s144_s6 }
  0x29   :  { %v71_v4 = vsub.f32 0.0, %v69_v2  ;;  %v72_v5 = vsub.f32 0.0, %v70_v3  ;;  %vm111_vm0 = vcmp.ge.f32.partialorder %v65_v0, 0.0  ;;  %v119_v29 = vsub.f32 1.0, %v67_v16  ;;  %s219_s7 = scalar_lea.vmem %s145_s6, 128  ;;  %p224_p3 = scmp.lt.s32.totalorder %s145_s6, %s145_s6 }
  0x2a   :  { %vm112_vm3 = vcmp.ge.f32.partialorder %v66_v1, 0.0  ;;  %v120_v36 = vsub.f32 1.0, %v68_v19  ;;  %v81_v37 = vsub.f32 %v77_v20, %v79_v23  ;;  %v82_v38 = vsub.f32 %v78_v22, %v80_v24  ;;  %p220_p2 = scmp.ne.s32.totalorder %s145_s6, %s219_s7  ;;  %p225_p4 = scmp.lt.s32.totalorder %s219_s7, %s219_s7 }
  0x2b   :  { %v73_v6 = vmul.f32 1.442695, %v71_v4  ;;  %v75_v7 = vmul.f32 1.442695, %v72_v5 }
  0x2c   :  { %p226_p5 = por %p225_p4, %p224_p3 }
  0x2d   :  { %163 = vpow2.f32 %v73_v6 }
  0x2e   :  { %165 = vpow2.f32 %v75_v7  ;;  %p227_p6 = pnand %p226_p5, %p220_p2 }
  0x37   :  { %v164_v8 = vpop.eup %163 }
  0x38   :  { %v166_v9 = vpop.eup %165  ;;  %v83_v10 = vadd.f32 1.0, %v164_v8  ;;  %v86_v12 = vmul.f32 -0.5, %v164_v8  ;;  %v89_v17 = vand.u32 2147483647, %v164_v8 }
  0x39   :  { %v92_v11 = vadd.f32 1.0, %v166_v9  ;;  %v95_v13 = vmul.f32 -0.5, %v166_v9  ;;  %v98_v18 = vand.u32 2147483647, %v166_v9 }
  0x3a   :  { %167 = vlog2.f32 %v83_v10  ;;  %v87_v14 = vadd.f32 1.0, %v86_v12  ;;  %vm291_vm1 = vcmp.lt.f32.partialorder %v89_v17, 0.0004427343 }
  0x3b   :  { %169 = vlog2.f32 %v92_v11  ;;  %v96_v15 = vadd.f32 1.0, %v95_v13  ;;  %vm295_vm2 = vcmp.lt.f32.partialorder %v98_v18, 0.0004427343 }
  0x3c   :  { %171 = vrcp.f32 %v83_v10  ;;  %v88_v27 = vmul.f32 %v164_v8, %v87_v14 }
  0x3d   :  { %173 = vrcp.f32 %v92_v11  ;;  %v97_v28 = vmul.f32 %v166_v9, %v96_v15 }
  0x44   :  { %v168_v21 = vpop.eup %167 }
  0x45   :  { %v170_v25 = vpop.eup %169  ;;  %v85_v26 = vmul.f32 0.6931472, %v168_v21 }
  0x46   :  { %v172_v30 = vpop.eup %171  ;;  %v94_v32 = vmul.f32 0.6931472, %v170_v25 }
  0x47   :  { %v174_v34 = vpop.eup %173  ;;  %v109_v35 = vmul.f32 %v172_v30, %v164_v8  ;;  %v91_v40 = vsel %vm291_vm1, %v88_v27, %v85_v26 }
  0x48   :  { %v110_v39 = vmul.f32 %v174_v34, %v166_v9  ;;  %v100_v41 = vsel %vm295_vm2, %v97_v28, %v94_v32  ;;  %v101_v50 = vadd.f32 %v91_v40, %v81_v37 }
  0x49   :  { %v113_v42 = vsel %vm111_vm0, %v172_v30, %v109_v35  ;;  %v115_v43 = vsel %vm111_vm0, %v109_v35, %v172_v30  ;;  %v102_v52 = vadd.f32 %v100_v41, %v82_v38 }
  0x4a   :  { %v114_v44 = vsel %vm112_vm3, %v174_v34, %v110_v39  ;;  %v116_v45 = vsel %vm112_vm3, %v110_v39, %v174_v34  ;;  %v117_v46 = vmul.f32 %v115_v43, %v67_v16  ;;  %v121_v47 = vmul.f32 %v119_v29, %v113_v42 }
  0x4b   :  { %v118_v48 = vmul.f32 %v116_v45, %v68_v19  ;;  %v122_v49 = vmul.f32 %v120_v36, %v114_v44 }
  0x4c   :  { %v123_v51 = vadd.f32 %v121_v47, %v117_v46 }
  0x4d   :  { %v124_v53 = vadd.f32 %v122_v49, %v118_v48 }
  0x4e   :  { %v125_v54 = vmul.f32 %v123_v51, %v123_v51 }
  0x4f   :  { %v126_v55 = vmul.f32 %v124_v53, %v124_v53 }
  0x50   :  { %v127_v56 = vmul.f32 %v125_v54, %v101_v50 }
  0x51   :  { %v128_v57 = vmul.f32 %v126_v55, %v102_v52 }
  0x53   :  { %v130_v58 = vadd.f32 %v128_v57, %v127_v56 }
  0x55   :  { %137 = vst [vmem:[#allocation8] sm:$0xff] %v130_v58 }
  0x56   :  { %230 = shalt.err (!%p227_p6)
}
  0x57   :  { %s231_s10 = scalar_lea.hbm %s319_s2, 128 }
  0x58   :  { %p232_p7 = scmp.ne.s32.totalorder %s319_s2, %s231_s10  ;;  %p235_p8 = scmp.lt.u32.totalorder %s231_s10, %s319_s2 }
  0x5a   :  { %p237_p9 = pnand %p235_p8, %p232_p7 }
  0x5c   :  { %240 = shalt.err (!%p237_p9)
}
  0x5d   :  { %147 = dma.vmem_to_hbm [thread:$0]  %s145_s6, 128, %s319_s2, [#allocation5]  }
  0x5e   :  { %245 = dma.done.wait [#allocation5], 128  }
  0x5f   :  { %246 = vsyncadd [#allocation5], 4294967168 }
  0x60   :  { %151 = vsyncpa [#allocation4], 1 }
  0x61   :  { %152 = vsyncpa [#allocation7], 1 }
  0x62   :  { %153 = vsyncpa [#allocation5], 1 }

</bundles_post_ra>
